<compile_context>
chip_gen: v6e
topology: v6e:2x2x1
jax: 0.10.0
libtpu: 0.0.40
codegen_flags: <defaults>
</compile_context>

<pallas_src>
import functools

import jax
import jax.numpy as jnp
from jax.experimental import pallas as pl
from jax.experimental.pallas import tpu as pltpu


def _round_up(v, m):
    return (v + m - 1) // m * m


def fused_linear_residual_kernel(x_ref, wt_ref, b_ref, o_ref):
    # One (tm, Dp) tile of x; weight/bias are whole and VMEM-resident across the grid.
    x = x_ref[...]                                                     # (tm, Dp) f32
    y = jnp.dot(x, wt_ref[...], preferred_element_type=jnp.float32)    # MXU
    o_ref[...] = (y + b_ref[...] + x).astype(o_ref.dtype)              # bias + residual (VPU)


@functools.partial(jax.jit, static_argnames=("tm",))
def fused_linear_residual(x, wt_p, b_p, *, tm=512):
    """x: (M, D); wt_p: (Dp, Dp) pre-padded, pre-transposed weight; b_p: (1, Dp).

    Returns (M, D) = x @ W^T + b + x.
    """
    M, D = x.shape
    Dp = wt_p.shape[0]
    assert wt_p.shape == (Dp, Dp) and b_p.shape == (1, Dp) and D <= Dp

    # --- batch-dim padding / tiling ---------------------------------------
    Mp = _round_up(M, 8)            # sublane-aligned batch dim (10 -> 16)
    tm = min(tm, Mp)                # clamp tile for tiny batches
    # Keep >= 2 grid steps when there is enough work so v7x's two TensorCores
    # both get a share of the ("parallel",) grid axis.
    if Mp > 8 and Mp // tm < 2:
        tm = max(8, _round_up(pl.cdiv(Mp, 2), 8))
    Mp = _round_up(Mp, tm)          # exact grid coverage (no ragged last block)

    x_p = jnp.pad(x, ((0, Mp - M), (0, Dp - D)))
    grid = (Mp // tm,)

    out_p = pl.pallas_call(
        fused_linear_residual_kernel,
        out_shape=jax.ShapeDtypeStruct((Mp, Dp), x.dtype),
        grid=grid,
        in_specs=[
            # x: streamed per M-tile (double-buffered HBM<->VMEM DMA).
            pl.BlockSpec((tm, Dp), lambda i: (i, 0)),
            # weight / bias: constant block index -> VMEM-resident, single buffer.
            pl.BlockSpec((Dp, Dp), lambda i: (0, 0), pipeline_mode=pl.Buffered(1)),
            pl.BlockSpec((1, Dp), lambda i: (0, 0), pipeline_mode=pl.Buffered(1)),
        ],
        out_specs=pl.BlockSpec((tm, Dp), lambda i: (i, 0)),
        compiler_params=pltpu.CompilerParams(
            dimension_semantics=("parallel",),
        ),
    )(x_p, wt_p, b_p)

    # Padded rows (M..Mp) only contain the bias; slice the padded slab back to
    # the logical (M, D) result (fused into the same jit as the kernel call).
    return out_p[:M, :D]


class Model:
    """JAX/Pallas mirror of the PyTorch Model (linear + residual add)."""

    def __init__(self, in_features=100, out_features=100, key=jax.random.PRNGKey(0)):
        # Deterministic init mimicking nn.Linear's default U(-1/sqrt(in), 1/sqrt(in)).
        kw, kb = jax.random.split(key)
        bound = 1.0 / jnp.sqrt(jnp.float32(in_features))
        # Store the weight already transposed: (in_features, out_features).
        self.w_t = jax.random.uniform(
            kw, (in_features, out_features), jnp.float32, -bound, bound
        )
        self.b = jax.random.uniform(
            kb, (1, out_features), jnp.float32, -bound, bound
        )
        # One-time lane padding of the constant weight/bias (100 -> 128).
        Dp = _round_up(out_features, 128)
        self.w_t_padded = jnp.pad(
            self.w_t, ((0, Dp - in_features), (0, Dp - out_features))
        )
        self.b_padded = jnp.pad(self.b, ((0, 0), (0, Dp - out_features)))

    def __call__(self, x):
        return fused_linear_residual(x, self.w_t_padded, self.b_padded)


if __name__ == "__main__":
    key = jax.random.PRNGKey(0)
    kx, kp = jax.random.split(key)

    # Input matching the reference script's x = torch.randn(10, 100).
    x = jax.random.normal(kx, (10, 100), dtype=jnp.float32)

    model = Model(in_features=100, out_features=100, key=kp)

    out = model(x)
    out = jax.block_until_ready(out)

    # Cross-check against a plain-JAX reference of the same fused math.
    ref = x @ model.w_t + model.b + x
    assert out.shape == (10, 100)
    assert jnp.allclose(out, ref, atol=1e-5, rtol=1e-5)

    print("KERNEL_OK")
</pallas_src>

<mosaic_0001>
module attributes {stable_mosaic.version = 11 : i64} {
  func.func @fused_linear_residual_kernel(%arg0: i32, %arg1: memref<8x128xf32, #tpu.memory_space<vmem>>, %arg2: memref<128x128xf32, #tpu.memory_space<vmem>>, %arg3: memref<1x128xf32, #tpu.memory_space<vmem>>, %arg4: memref<8x128xf32, #tpu.memory_space<vmem>>) attributes {dimension_semantics = [#tpu.dimension_semantics<parallel>], iteration_bounds = array<i64: 2>, scalar_prefetch = 0 : i64, scratch_operands = 0 : i64, tpu.core_type = #tpu.core_type<tc>, window_params = [{transform_indices = @transform_0, window_bounds = array<i64: 8, 128>}, {pipeline_mode = #tpu.pipeline_mode<synchronous>, transform_indices = @transform_1, window_bounds = array<i64: 128, 128>}, {pipeline_mode = #tpu.pipeline_mode<synchronous>, transform_indices = @transform_2, window_bounds = array<i64: 1, 128>}, {transform_indices = @transform_3, window_bounds = array<i64: 8, 128>}]} {
    %c0 = arith.constant 0 : index
    %c0_0 = arith.constant 0 : index
    %0 = vector.load %arg1[%c0, %c0_0] : memref<8x128xf32, #tpu.memory_space<vmem>>, vector<8x128xf32>
    %c0_1 = arith.constant 0 : index
    %c0_2 = arith.constant 0 : index
    %1 = vector.load %arg2[%c0_1, %c0_2] : memref<128x128xf32, #tpu.memory_space<vmem>>, vector<128x128xf32>
    %cst = arith.constant dense<0.000000e+00> : vector<8x128xf32>
    %2 = tpu.matmul %0, %1, %cst {dimension_numbers = #tpu.dot_dimension_numbers<[1], [0], [0], [1], [0, 0, 1, 1], [], []>} : vector<8x128xf32>, vector<128x128xf32>, vector<8x128xf32> -> vector<8x128xf32>
    %c0_3 = arith.constant 0 : index
    %c0_4 = arith.constant 0 : index
    %3 = vector.load %arg3[%c0_3, %c0_4] : memref<1x128xf32, #tpu.memory_space<vmem>>, vector<1x128xf32>
    %4 = vector.broadcast %3 : vector<1x128xf32> to vector<8x128xf32>
    %5 = arith.addf %2, %4 : vector<8x128xf32>
    %6 = arith.addf %5, %0 : vector<8x128xf32>
    %c0_5 = arith.constant 0 : index
    %c0_6 = arith.constant 0 : index
    %7 = vector.load %arg4[%c0_5, %c0_6] : memref<8x128xf32, #tpu.memory_space<vmem>>, vector<8x128xf32>
    tpu.vector_store %arg4[%c0_5, %c0_6], %6 {strides = array<i32>} : memref<8x128xf32, #tpu.memory_space<vmem>>, vector<8x128xf32>,
    return
  }
  func.func @transform_0(%arg0: i32) -> (i32, i32) {
    %c0_i32 = arith.constant 0 : i32
    %c0_i32_0 = arith.constant 0 : i32
    return %arg0, %c0_i32 : i32, i32
  }
  func.func @transform_1(%arg0: i32) -> (i32, i32) {
    %c0_i32 = arith.constant 0 : i32
    %c0_i32_0 = arith.constant 0 : i32
    %c0_i32_1 = arith.constant 0 : i32
    return %c0_i32, %c0_i32_0 : i32, i32
  }
  func.func @transform_2(%arg0: i32) -> (i32, i32) {
    %c0_i32 = arith.constant 0 : i32
    %c0_i32_0 = arith.constant 0 : i32
    %c0_i32_1 = arith.constant 0 : i32
    return %c0_i32, %c0_i32_0 : i32, i32
  }
  func.func @transform_3(%arg0: i32) -> (i32, i32) {
    %c0_i32 = arith.constant 0 : i32
    %c0_i32_0 = arith.constant 0 : i32
    return %arg0, %c0_i32 : i32, i32
  }
}

</mosaic_0001>

<bundles_post_ra>
// kernel: fused_linear_residual.1
= control target key start
LH: loop header
LB: loop body
LE: loop exit
PB: predicated region body
PF: predicated region fallthrough
CT: control target
= control target key end

     0   :  { %8 = vsyncpa [#allocation3], 0  ;;  %s707_s0 = inlined_call_operand.vmem [shape: f32[16,128], index: 0, kind: input, shape index: {}]   ;;  %s708_s1 = inlined_call_operand.hbm [shape: f32[128,128], index: 1, kind: input, shape index: {}]   ;;  %s709_s2 = inlined_call_operand.vmem [shape: f32[1,128], index: 2, kind: input, shape index: {}]   ;;  %s710_s3 = inlined_call_operand.hbm [shape: f32[16,128], index: 3, kind: output, shape index: {}]  }
   0x1   :  { %9 = vsyncpa [#allocation4], 0 }
   0x2   :  { %11 = vsyncpa [#allocation4 + $0x1], 0  ;;  %s599_s12 = smov 0   ;;  %s601_s13 = smov 0  }
   0x3   :  { %s603_s14 = smov 0   ;;  %s605_s15 = smov 0  }
   0x4 LB: > { %s620_s16 = sadd.s32 4294967295, %s571_s15   ;;  %s362_s17 = sadd.s32 4294967294, %s571_s15   ;;  %s571_s15 = sphi %s605_s15, %s718_s15   ;;  %s567_s14 = sphi %s603_s14, %s717_s14   ;;  %s563_s13 = sphi %s601_s13, %s716_s13   ;;  %s559_s12 = sphi %s599_s12, %s715_s12  }
   0x5   : > { %s624_s18 = sadd.s32 1, %s571_s15   ;;  %s92_s19 = sadd.s32 1, %s567_s14 }
   0x6   : > { %s89_s20 = ssub.s32 %s571_s15, %s624_s18  ;;  %p102_p0 = scmp.ne.s32.totalorder %s567_s14, %s563_s13 }
   0x7   : > { %p90_p1 = scmp.eq.s32.totalorder %s89_s20, 0  ;;  %p103_p2 = scmp.eq.s32.totalorder %s620_s16, 1 }
   0x8   : > { %p108_p3 = scmp.ne.s32.totalorder %s563_s13, %s559_s12  ;;  %p109_p4 = scmp.eq.s32.totalorder %s362_s17, 1 }
   0x9   : > { %s635_s21 = scalar_select %p90_p1, %s567_s14, %s92_s19  }
   0xa   : > { %p637_p5 = por %p103_p2, %p102_p0  ;;  %p641_p6 = por %p109_p4, %p108_p3 }
   0xb   : > { %p363_p7 = scmp.ge.s32.totalorder %s571_s15, 1  ;;  %p116_p8 = scmp.lt.s32.totalorder %s571_s15, 3 }
   0xc   : > { %s712_s23 = scalar_select %p641_p6, 1, 0 }
   0xd   : > { %p441_p9 = scmp.eq.s32.totalorder %s620_s16, 0  ;;  %p648_p10 = pnand %p363_p7, %p116_p8 }
   0xe   : > { %s573_s25 = smov [#allocation2]  }
   0xf   : > { %s128_s26 = sshll.u32 %s573_s25, 4  ;;  %p433_p11 = pneg %p648_p10  ;;  %s129_s26 = int_to_ptr.vmem [resolvable:$true] %s128_s26 }
  0x10   : > { %s492_s27 = scalar_lea.vmem %s129_s26, 2048  ;;  %p500_p3 = scmp.lt.s32.totalorder %s129_s26, %s129_s26 }
  0x11   : > { %p434_p12 = pnand %p441_p9, %p433_p11  ;;  %p493_p0 = scmp.ne.s32.totalorder %s129_s26, %s492_s27 }
  0x12   : > { %p501_p4 = scmp.lt.s32.totalorder %s492_s27, %s492_s27 }
  0x13   : > { %p483_p13 = pneg %p434_p12 }
  0x14   : > { %p502_p6 = por %p501_p4, %p500_p3 }
  0x15   : > { %p495_p1 = pnand %p493_p0, %p483_p13 }
  0x17   : > { %p496_p2 = pneg %p495_p1 }
  0x19   : > { %p503_p7 = pnand %p502_p6, %p496_p2 }
  0x1b   : > { %506 = shalt.err (!%p503_p7)
}
  0x1c   : > { %s574_s28 = smov 128   ;;  %s575_s29 = smov 8  }
  0x1d   : > { %436 = dma.hbm_to_vmem [thread:$0]  (!%p434_p12), %s708_s1, 2048, %s129_s26, [#allocation3], %s574_s28, %s574_s28, %s575_s29  }
  0x1e   : > { %154 = sbr.rel (%p648_p10) target bundleno = 279 (0x117), region = 32 }
  0x23   : > { %550 = dma.done.wait (%p441_p9), [#allocation3], 2048  }
  0x24   : > { %552 = vsyncadd (%p441_p9), [#allocation3], 4294965248  ;;  %v576_v0 = vmov 0.0   ;;  %vm577_vm0 = vmmov 0   ;;  %v197_v1 = vld [vmem:[#allocation2 + $0x78] sm:$0xff]  ;;  %v196_v2 = vld [vmem:[#allocation2 + $0x70] sm:$0xff] }
  0x25   : > { %392 = vmatprep.subr.mxu0 %v576_v0  ;;  %424 = vmatprep.mubr.msk.f32.mxu0 %vm577_vm0, %v576_v0  ;;  %v195_v3 = vld [vmem:[#allocation2 + $0x68] sm:$0xff]  ;;  %v194_v4 = vld [vmem:[#allocation2 + $0x60] sm:$0xff]  ;;  %v193_v5 = vld [vmem:[#allocation2 + $0x58] sm:$0xff]  ;;  %p177_p6 = scmp.lt.s32.totalorder %s620_s16, 1  ;;  %s174_s10 = sand.u32 1, %s563_s13  }
  0x26   : > { %393 = vmatpush3.msra.mxu0 %v197_v1  ;;  %v192_v6 = vld [vmem:[#allocation2 + $0x50] sm:$0xff]  ;;  %v191_v7 = vld [vmem:[#allocation2 + $0x48] sm:$0xff]  ;;  %v190_v8 = vld [vmem:[#allocation2 + $0x40] sm:$0xff]  ;;  %s368_s11 = sshll.u32 %s174_s10, 3  ;;  %s372_s20 = sshll.u32 %s620_s16, 7 }
  0x27   : > { %394 = vmatprep.subr.mxu0 %v576_v0  ;;  %v189_v9 = vld [vmem:[#allocation2 + $0x38] sm:$0xff]  ;;  %v188_v10 = vld [vmem:[#allocation2 + $0x30] sm:$0xff]  ;;  %v187_v11 = vld [vmem:[#allocation2 + $0x28] sm:$0xff]  ;;  %s178_s5 = scalar_select %p177_p6, %s620_s16, 1 }
  0x28   : > { %395 = vmatpush3.msra.mxu0 %v196_v2  ;;  %v186_v12 = vld [vmem:[#allocation2 + $0x20] sm:$0xff]  ;;  %v185_v13 = vld [vmem:[#allocation2 + $0x18] sm:$0xff]  ;;  %v184_v14 = vld [vmem:[#allocation2 + $0x10] sm:$0xff]  ;;  %s176_s24 = scalar_lea.vmem [#allocation5], %s368_s11  ;;  %s289_s28 = scalar_lea.hbm %s710_s3, %s372_s20 }
  0x29   : > { %396 = vmatprep.subr.mxu0 %v576_v0  ;;  %s369_s6 = sshll.u32 %s178_s5, 3  ;;  %v183_v15 = vld [vmem:[#allocation2 + $0x8] sm:$0xff]  ;;  %v182_v16 = vld [vmem:[#allocation2] sm:$0xff]  ;;  %s291_s25 = sshll.u32 %s176_s24, 4  ;;  %s292_s25 = int_to_ptr.vmem [resolvable:$true] %s291_s25 }
  0x2a   : > { %397 = vmatpush3.msra.mxu0 %v195_v3  ;;  %s180_s9 = scalar_lea.vmem %s707_s0, %s369_s6  ;;  %v370_v18 = vld [vmem:[%s709_s2] ss:$0 sm:$0xff]  ;;  %s278_s29 = scalar_lea.sflag [#allocation4], %s174_s10 }
  0x2b   : > { %398 = vmatprep.subr.mxu0 %v576_v0  ;;  %v181_v17 = vld [vmem:[%s180_s9] sm:$0xff]  ;;  %s507_s30 = scalar_lea.vmem %s292_s25, 128  ;;  %s578_s4 = smov [#allocation5]  }
  0x2c   : > { %399 = vmatpush3.msra.mxu0 %v194_v4  ;;  %p508_p8 = scmp.ne.s32.totalorder %s292_s25, %s507_s30  ;;  %s511_s5 = sshll.u32 %s578_s4, 4  ;;  %s512_s5 = int_to_ptr.vmem [resolvable:$false] %s511_s5 }
  0x2d   : > { %400 = vmatprep.subr.mxu0 %v576_v0  ;;  %s513_s16 = scalar_lea.vmem %s512_s5, 256  ;;  %p514_p11 = scmp.lt.s32.totalorder %s292_s25, %s512_s5 }
  0x2e   : > { %401 = vmatpush3.msra.mxu0 %v193_v5  ;;  %p509_p9 = pnand %p508_p8, %p637_p5  ;;  %p515_p12 = scmp.lt.s32.totalorder %s513_s16, %s507_s30 }
  0x2f   : > { %402 = vmatprep.subr.mxu0 %v576_v0 }
  0x30   : > { %403 = vmatpush3.msra.mxu0 %v192_v6  ;;  %p510_p10 = pneg %p509_p9  ;;  %p516_p13 = por %p515_p12, %p514_p11 }
  0x31   : > { %404 = vmatprep.subr.mxu0 %v576_v0 }
  0x32   : > { %405 = vmatpush3.msra.mxu0 %v191_v7  ;;  %p517_p0 = pnand %p516_p13, %p510_p10 }
  0x33   : > { %406 = vmatprep.subr.mxu0 %v576_v0 }
  0x34   : > { %407 = vmatpush3.msra.mxu0 %v190_v8 }
  0x35   : > { %408 = vmatprep.subr.mxu0 %v576_v0 }
  0x36   : > { %409 = vmatpush3.msra.mxu0 %v189_v9 }
  0x37   : > { %410 = vmatprep.subr.mxu0 %v576_v0 }
  0x38   : > { %411 = vmatpush3.msra.mxu0 %v188_v10 }
  0x39   : > { %412 = vmatprep.subr.mxu0 %v576_v0 }
  0x3a   : > { %413 = vmatpush3.msra.mxu0 %v187_v11 }
  0x3b   : > { %414 = vmatprep.subr.mxu0 %v576_v0 }
  0x3c   : > { %415 = vmatpush3.msra.mxu0 %v186_v12 }
  0x3d   : > { %416 = vmatprep.subr.mxu0 %v576_v0 }
  0x3e   : > { %417 = vmatpush3.msra.mxu0 %v185_v13 }
  0x3f   : > { %418 = vmatprep.subr.mxu0 %v576_v0 }
  0x40   : > { %419 = vmatpush3.msra.mxu0 %v184_v14 }
  0x41   : > { %420 = vmatprep.subr.mxu0 %v576_v0 }
  0x42   : > { %421 = vmatpush3.msra.mxu0 %v183_v15 }
  0x43   : > { %422 = vmatprep.subr.mxu0 %v576_v0 }
  0x44   : > { %423 = vmatpush3.msra.mxu0 %v182_v16 }
  0x45   : > { %425 = vmatmul.mubr.f32.vlgmr.msra.gmra.mxu0 %v181_v17 }
 0x105   : > { %v271_v19 = vpop.f32.mrf.mxu0 }
 0x106   : > { %v272_v20 = vadd.f32 %v370_v18, %v271_v19 }
 0x107   : > { %v426_v21 = vpop.f32.mrf.mxu0 }
 0x108   : > { %v275_v22 = vadd.f32 %v272_v20, %v181_v17 }
 0x10a   : > { %276 = vst [vmem:[%s176_s24] sm:$0xff] %v275_v22 }
 0x10b   : > { %520 = shalt.err (!%p517_p0)
}
 0x10c   : > { %s521_s6 = scalar_lea.hbm %s289_s28, 128  ;;  %s525_s9 = scalar_lea.hbm %s710_s3, 256 }
 0x10d   : > { %p522_p1 = scmp.ne.s32.totalorder %s289_s28, %s521_s6  ;;  %p526_p4 = scmp.lt.s32.totalorder %s289_s28, %s710_s3 }
 0x10e   : > { %p527_p7 = scmp.lt.s32.totalorder %s525_s9, %s521_s6 }
 0x10f   : > { %p523_p2 = pnand %p522_p1, %p637_p5 }
 0x110   : > { %p528_p6 = por %p527_p7, %p526_p4 }
 0x111   : > { %p524_p3 = pneg %p523_p2 }
 0x113   : > { %p529_p8 = pnand %p528_p6, %p524_p3 }
 0x115   : > { %532 = shalt.err (!%p529_p8)
}
 0x116   : > { %431 = dma.vmem_to_hbm [thread:$0]  (%p637_p5), %s292_s25, 128, %s289_s28, %s278_s29  }
 0x117 PF: > { %p443_p9 = scmp.ge.s32.totalorder %s571_s15, 2  ;;  %s303_s17 = sand.u32 1, %s559_s12  }
 0x118   : > { %p714_p10 = scmp.ne.s32.totalorder %s712_s23, 0  ;;  %s304_s19 = scalar_lea.sflag [#allocation4], %s303_s17 }
 0x11a   : > { %p438_p11 = pnand %p443_p9, %p714_p10 }
 0x11c   : > { %p439_p12 = pneg %p438_p11 }
 0x11e   : > { %554 = dma.done.wait (%p439_p12), %s304_s19, 128  }
 0x11f   : > { %556 = vsyncadd (%p439_p12), %s304_s19, 4294967168  ;;  %p14_p13 = scmp.ge.s32.totalorder %s624_s18, 4   ;;  %s715_s12 = smov %s563_s13 }
 0x120   : > { %s716_s13 = smov %s567_s14  ;;  %s717_s14 = smov %s635_s21 }
 0x121   : > { %s718_s15 = smov %s624_s18  ;;  %16 = sbr.rel (!%p14_p13) target bundleno = 4 (0x4), region = 72 }
 0x126   :  { %309 = vsyncpa [#allocation3], 1 }
 0x127   :  { %311 = vsyncpa [#allocation3 + $0x1], 1 }
 0x128   :  { %312 = vsyncpa [#allocation4], 1 }
 0x129   :  { %314 = vsyncpa [#allocation4 + $0x1], 1 }

</bundles_post_ra>
